<compile_context>
chip_gen: v7x
topology: tpu7x:2x2x1
jax: 0.10.0
libtpu: 0.0.40
codegen_flags: <defaults>
</compile_context>

<pallas_src>
import functools
import inspect

import jax
import jax.numpy as jnp
from jax.experimental import pallas as pl
from jax.experimental.pallas import tpu as pltpu

LEAKY_SLOPE = 0.01    # nn.LeakyReLU default
LN_EPS = 1e-5         # nn.LayerNorm default
LANE = 128            # TPU lane width
SUBLANE_PACK = 16     # bf16 packed sublanes -> minimum useful row tile


def _round_up(n, m):
    return ((n + m - 1) // m) * m


def _pad2d(a, rows, cols):
    r, c = a.shape
    return jnp.pad(a, ((0, rows - r), (0, cols - c)))


def _pick_tile_b(batch, *, min_tiles=2):
    """Adaptive batch tile.

    - batch <= 16: single 16-row tile (bf16 sublane pack), no over-padding.
    - medium batches: split so the grid has >= `min_tiles` steps (v7x has
      2 TensorCores; extra grid steps cost ~0.35us each on 1-TC chips).
    - large batches: 256/512-row tiles to amortize per-step overhead / DMA.
    """
    if batch <= SUBLANE_PACK:
        return SUBLANE_PACK
    if batch >= 4096:
        cand = 512
    elif batch >= 1024:
        cand = 256
    elif batch >= 256:
        cand = 128
    else:
        cand = _round_up(-(-batch // max(min_tiles, 1)), SUBLANE_PACK)
    while (min_tiles > 1 and cand > SUBLANE_PACK
           and _round_up(batch, cand) // cand < min_tiles):
        cand = max(SUBLANE_PACK, _round_up(cand // 2, SUBLANE_PACK))
    return cand


def _blockspec_has_pipeline_mode():
    try:
        return ("pipeline_mode" in inspect.signature(pl.BlockSpec).parameters
                and hasattr(pl, "Buffered"))
    except (TypeError, ValueError):
        return False


_HAS_PIPELINE_MODE = _blockspec_has_pipeline_mode()


def _resident_spec(shape):
    """Constant-index (VMEM-resident) BlockSpec. Single-buffered when the JAX
    version supports it: resident weights gain nothing from the default
    double-buffering, which would double their VMEM footprint."""
    if _HAS_PIPELINE_MODE:
        return pl.BlockSpec(shape, lambda i: (0, 0), pipeline_mode=pl.Buffered(1))
    return pl.BlockSpec(shape, lambda i: (0, 0))


def _physical_vmem_bytes():
    """Per-generation VMEM capacity; conservative v7x-sized fallback."""
    try:
        return int(pltpu.get_tpu_info().vmem_capacity_bytes)
    except Exception:
        return 64 << 20


def _ffnn_kernel(n_hidden, hidden_real, x_ref, *refs):
    """Fused FFNN forward over one batch tile.

    refs layout:
      for each hidden layer i: (w_i, b_i, gamma_i, beta_i)   -> 4*n_hidden refs
      final layer:             (w_out, b_out)                -> 2 refs
      out_ref                                                -> 1 ref

    Feature dims are zero-padded to 128-lane multiples. Padded lanes of every
    post-linear activation z are exactly zero (zero W columns / bias), so the
    LayerNorm sums over all lanes already equal the real-lane sums and no lane
    masking is needed; gamma/beta are zero on padded lanes, which re-zeroes the
    output so padding stays zero through every layer.
    """
    param_refs = refs[:-1]
    out_ref = refs[-1]

    h = x_ref[...]  # bf16 (tile_b, in_pad)

    for i in range(n_hidden):
        w, b, gamma, beta = param_refs[4 * i: 4 * i + 4]
        # Linear on the MXU: bf16 x bf16 -> f32 accumulator, f32 bias add.
        z = jnp.dot(h, w[...], preferred_element_type=jnp.float32) + b[...]
        # LayerNorm over the *real* hidden width (padded lanes contribute 0).
        inv_n = 1.0 / float(hidden_real[i])
        mean = jnp.sum(z, axis=-1, keepdims=True) * inv_n
        mean_sq = jnp.sum(z * z, axis=-1, keepdims=True) * inv_n
        var = jnp.maximum(mean_sq - mean * mean, 0.0)
        y = (z - mean) * jax.lax.rsqrt(var + LN_EPS)
        y = y * gamma[...] + beta[...]        # padded lanes -> 0 (gamma=beta=0)
        # LeakyReLU
        y = jnp.where(y > 0, y, LEAKY_SLOPE * y)
        # Dropout(p=0.1): identity in eval mode.
        # TODO(synk): train-mode dropout (pltpu.prng_seed + prng_random_bits mask) not emitted.
        h = y.astype(jnp.bfloat16)

    w_out, b_out = param_refs[4 * n_hidden:]
    out = jnp.dot(h, w_out[...], preferred_element_type=jnp.float32) + b_out[...]
    out_ref[...] = out.astype(out_ref.dtype)


def ffnn_forward(x, params, *, tile_b=None, out_dtype=jnp.float32):
    """x: (batch, input_size) f32. params: flat list (unpadded, PyTorch-like)."""
    n_hidden = (len(params) - 2) // 4
    batch, in_size = x.shape
    out_size = int(params[-1].shape[-1])

    hidden_real = tuple(int(params[4 * i].shape[-1]) for i in range(n_hidden))
    widths_real = (in_size,) + hidden_real + (out_size,)
    widths_pad = tuple(_round_up(w, LANE) for w in widths_real)
    in_pad, out_pad = widths_pad[0], widths_pad[-1]

    if tile_b is None:
        tile_b = _pick_tile_b(batch)
    b_pad = _round_up(batch, tile_b)

    # Pad + cast operands. Weights -> bf16 (MXU-native); bias/gamma/beta stay
    # f32 and are applied on the f32 accumulator. Padded gamma/beta lanes are 0
    # so padded activations remain exactly 0 after every layer.
    x_p = _pad2d(x, b_pad, in_pad).astype(jnp.bfloat16)
    params_p = []
    for i in range(n_hidden):
        w, b, g, bt = params[4 * i: 4 * i + 4]
        hp = widths_pad[i + 1]
        params_p += [
            _pad2d(w, widths_pad[i], hp).astype(jnp.bfloat16),
            _pad2d(b, 1, hp),
            _pad2d(g, 1, hp),
            _pad2d(bt, 1, hp),
        ]
    w_out, b_out = params[-2:]
    params_p += [
        _pad2d(w_out, widths_pad[-2], out_pad).astype(jnp.bfloat16),
        _pad2d(b_out, 1, out_pad),
    ]

    grid = (b_pad // tile_b,)

    # x/out tiled over the batch grid; every parameter VMEM-resident across
    # grid steps (constant block index, single-buffered when supported).
    in_specs = [pl.BlockSpec((tile_b, in_pad), lambda i: (i, 0))]
    in_specs += [_resident_spec(p.shape) for p in params_p]
    out_specs = pl.BlockSpec((tile_b, out_pad), lambda i: (i, 0))

    # --- Per-generation VMEM budget (leave headroom for Mosaic scratch) ---
    out_itemsize = jnp.dtype(out_dtype).itemsize
    param_bytes = sum(int(p.size) * p.dtype.itemsize for p in params_p)
    param_buf = 1 if _HAS_PIPELINE_MODE else 2       # double-buffered if no Buffered(1)
    act_bytes = 2 * tile_b * in_pad * 2 + 2 * tile_b * out_pad * out_itemsize
    inter_bytes = 6 * tile_b * max(widths_pad) * 4   # live f32 z/y intermediates
    needed = param_buf * param_bytes + act_bytes + inter_bytes
    physical = _physical_vmem_bytes()                # 64 MiB v7x, 128 MiB v5e/v6e
    vmem_limit = min(int(0.85 * physical),
                     max(32 << 20, int(1.25 * needed) + (4 << 20)))
    # TODO(synk): once resident bf16 weights exceed ~24-32 MiB (v7x) or ~64 MiB
    # (v5e/v6e), switch to a weight-streaming "arbitrary" grid axis with a
    # pl.when-zeroed f32 VMEM accumulator instead of the all-resident path.

    flops = 0
    for a, c in zip(widths_pad[:-1], widths_pad[1:]):
        flops += 2 * b_pad * a * c
    bytes_accessed = param_bytes + int(x_p.size) * 2 + b_pad * out_pad * out_itemsize
    cost = pl.CostEstimate(flops=flops,
                           transcendentals=b_pad * n_hidden,
                           bytes_accessed=bytes_accessed)

    kernel = functools.partial(_ffnn_kernel, n_hidden, hidden_real)
    out_p = pl.pallas_call(
        kernel,
        out_shape=jax.ShapeDtypeStruct((b_pad, out_pad), out_dtype),
        grid=grid,
        in_specs=in_specs,
        out_specs=out_specs,
        compiler_params=pltpu.CompilerParams(
            dimension_semantics=("parallel",),
            vmem_limit_bytes=vmem_limit),
        cost_estimate=cost,
    )(x_p, *params_p)

    return out_p[:batch, :out_size]


def init_params(key, input_size, hidden_sizes, output_size):
    """Deterministic init mirroring nn.Linear / nn.LayerNorm shapes."""
    params = []
    prev = input_size
    for h in hidden_sizes:
        key, kw, kb = jax.random.split(key, 3)
        bound = 1.0 / jnp.sqrt(prev)
        w = jax.random.uniform(kw, (prev, h), jnp.float32, -bound, bound)
        b = jax.random.uniform(kb, (1, h), jnp.float32, -bound, bound)
        gamma = jnp.ones((1, h), jnp.float32)   # LayerNorm weight
        beta = jnp.zeros((1, h), jnp.float32)   # LayerNorm bias
        params += [w, b, gamma, beta]
        prev = h
    key, kw, kb = jax.random.split(key, 3)
    bound = 1.0 / jnp.sqrt(prev)
    w_out = jax.random.uniform(kw, (prev, output_size), jnp.float32, -bound, bound)
    b_out = jax.random.uniform(kb, (1, output_size), jnp.float32, -bound, bound)
    params += [w_out, b_out]
    return params


def ffnn_reference_bf16(x, params):
    """Pure-JAX reference with the same numerics (bf16 matmul, f32 accumulate)."""
    n_hidden = (len(params) - 2) // 4
    h = x
    for i in range(n_hidden):
        w, b, gamma, beta = params[4 * i: 4 * i + 4]
        z = jnp.dot(h.astype(jnp.bfloat16), w.astype(jnp.bfloat16),
                    preferred_element_type=jnp.float32) + b
        mean = jnp.mean(z, axis=-1, keepdims=True)
        var = jnp.mean((z - mean) ** 2, axis=-1, keepdims=True)
        z = (z - mean) * jax.lax.rsqrt(var + LN_EPS)
        z = z * gamma + beta
        h = jnp.where(z > 0, z, LEAKY_SLOPE * z)
    w_out, b_out = params[-2:]
    return jnp.dot(h.astype(jnp.bfloat16), w_out.astype(jnp.bfloat16),
                   preferred_element_type=jnp.float32) + b_out


def ffnn_reference_f32(x, params):
    """Pure-f32 reference of the original module (eval mode)."""
    n_hidden = (len(params) - 2) // 4
    h = x
    for i in range(n_hidden):
        w, b, gamma, beta = params[4 * i: 4 * i + 4]
        h = h @ w + b
        mean = jnp.mean(h, axis=-1, keepdims=True)
        var = jnp.mean((h - mean) ** 2, axis=-1, keepdims=True)
        h = (h - mean) / jnp.sqrt(var + LN_EPS)
        h = h * gamma + beta
        h = jnp.where(h > 0, h, LEAKY_SLOPE * h)
    w_out, b_out = params[-2:]
    return h @ w_out + b_out


if __name__ == "__main__":
    input_size = 32
    hidden_sizes = [64, 32]
    output_size = 16
    batch = 8

    key = jax.random.PRNGKey(0)
    key, kx = jax.random.split(key)
    x = jax.random.normal(kx, (batch, input_size), jnp.float32)
    params = init_params(key, input_size, hidden_sizes, output_size)

    out = ffnn_forward(x, params)
    jax.block_until_ready(out)
    assert out.shape == (batch, output_size)

    ref_bf16 = ffnn_reference_bf16(x, params)
    assert jnp.allclose(out, ref_bf16, atol=1e-3, rtol=1e-3), "mismatch vs bf16 reference"

    # NOTE: bf16 MXU operands mean results deviate slightly from the f32
    # PyTorch module; loose tolerance check against the f32 reference below.
    ref_f32 = ffnn_reference_f32(x, params)
    assert jnp.allclose(out, ref_f32, atol=0.15, rtol=0.15), "mismatch vs f32 reference"

    print("KERNEL_OK")
</pallas_src>

<mosaic_0001>
module attributes {stable_mosaic.version = 11 : i64} {
  func.func @_ffnn_kernel(%arg0: i32, %arg1: memref<16x128xbf16, #tpu.memory_space<vmem>>, %arg2: memref<128x128xbf16, #tpu.memory_space<vmem>>, %arg3: memref<1x128xf32, #tpu.memory_space<vmem>>, %arg4: memref<1x128xf32, #tpu.memory_space<vmem>>, %arg5: memref<1x128xf32, #tpu.memory_space<vmem>>, %arg6: memref<128x128xbf16, #tpu.memory_space<vmem>>, %arg7: memref<1x128xf32, #tpu.memory_space<vmem>>, %arg8: memref<1x128xf32, #tpu.memory_space<vmem>>, %arg9: memref<1x128xf32, #tpu.memory_space<vmem>>, %arg10: memref<128x128xbf16, #tpu.memory_space<vmem>>, %arg11: memref<1x128xf32, #tpu.memory_space<vmem>>, %arg12: memref<16x128xf32, #tpu.memory_space<vmem>>) attributes {dimension_semantics = [#tpu.dimension_semantics<parallel>], iteration_bounds = array<i64: 1>, scalar_prefetch = 0 : i64, scratch_operands = 0 : i64, tpu.core_type = #tpu.core_type<tc>, window_params = [{transform_indices = @transform_0, window_bounds = array<i64: 16, 128>}, {pipeline_mode = #tpu.pipeline_mode<synchronous>, transform_indices = @transform_1, window_bounds = array<i64: 128, 128>}, {pipeline_mode = #tpu.pipeline_mode<synchronous>, transform_indices = @transform_2, window_bounds = array<i64: 1, 128>}, {pipeline_mode = #tpu.pipeline_mode<synchronous>, transform_indices = @transform_3, window_bounds = array<i64: 1, 128>}, {pipeline_mode = #tpu.pipeline_mode<synchronous>, transform_indices = @transform_4, window_bounds = array<i64: 1, 128>}, {pipeline_mode = #tpu.pipeline_mode<synchronous>, transform_indices = @transform_5, window_bounds = array<i64: 128, 128>}, {pipeline_mode = #tpu.pipeline_mode<synchronous>, transform_indices = @transform_6, window_bounds = array<i64: 1, 128>}, {pipeline_mode = #tpu.pipeline_mode<synchronous>, transform_indices = @transform_7, window_bounds = array<i64: 1, 128>}, {pipeline_mode = #tpu.pipeline_mode<synchronous>, transform_indices = @transform_8, window_bounds = array<i64: 1, 128>}, {pipeline_mode = #tpu.pipeline_mode<synchronous>, transform_indices = @transform_9, window_bounds = array<i64: 128, 128>}, {pipeline_mode = #tpu.pipeline_mode<synchronous>, transform_indices = @transform_10, window_bounds = array<i64: 1, 128>}, {transform_indices = @transform_11, window_bounds = array<i64: 16, 128>}]} {
    %c0 = arith.constant 0 : index
    %c0_0 = arith.constant 0 : index
    %0 = vector.load %arg1[%c0, %c0_0] : memref<16x128xbf16, #tpu.memory_space<vmem>>, vector<16x128xbf16>
    %c0_1 = arith.constant 0 : index
    %c0_2 = arith.constant 0 : index
    %1 = vector.load %arg2[%c0_1, %c0_2] : memref<128x128xbf16, #tpu.memory_space<vmem>>, vector<128x128xbf16>
    %cst = arith.constant dense<0.000000e+00> : vector<16x128xf32>
    %2 = tpu.matmul %0, %1, %cst {dimension_numbers = #tpu.dot_dimension_numbers<[1], [0], [0], [1], [0, 0, 1, 1], [], []>} : vector<16x128xbf16>, vector<128x128xbf16>, vector<16x128xf32> -> vector<16x128xf32>
    %c0_3 = arith.constant 0 : index
    %c0_4 = arith.constant 0 : index
    %3 = vector.load %arg3[%c0_3, %c0_4] : memref<1x128xf32, #tpu.memory_space<vmem>>, vector<1x128xf32>
    %4 = vector.broadcast %3 : vector<1x128xf32> to vector<16x128xf32>
    %5 = arith.addf %2, %4 : vector<16x128xf32>
    %cst_5 = arith.constant dense<0.000000e+00> : vector<16xf32>
    %6 = vector.multi_reduction <add>, %5, %cst_5 [1] : vector<16x128xf32> to vector<16xf32>
    %7 = vector.shape_cast %6 : vector<16xf32> to vector<16x1xf32>
    %cst_6 = arith.constant 1.562500e-02 : f32
    %8 = vector.broadcast %cst_6 : f32 to vector<16x1xf32>
    %9 = arith.mulf %7, %8 : vector<16x1xf32>
    %10 = arith.mulf %5, %5 : vector<16x128xf32>
    %cst_7 = arith.constant dense<0.000000e+00> : vector<16xf32>
    %11 = vector.multi_reduction <add>, %10, %cst_7 [1] : vector<16x128xf32> to vector<16xf32>
    %12 = vector.shape_cast %11 : vector<16xf32> to vector<16x1xf32>
    %cst_8 = arith.constant 1.562500e-02 : f32
    %13 = vector.broadcast %cst_8 : f32 to vector<16x1xf32>
    %14 = arith.mulf %12, %13 : vector<16x1xf32>
    %15 = arith.mulf %9, %9 : vector<16x1xf32>
    %16 = arith.subf %14, %15 : vector<16x1xf32>
    %cst_9 = arith.constant 0.000000e+00 : f32
    %17 = vector.broadcast %cst_9 : f32 to vector<16x1xf32>
    %18 = arith.maximumf %16, %17 : vector<16x1xf32>
    %19 = vector.broadcast %9 : vector<16x1xf32> to vector<16x128xf32>
    %20 = arith.subf %5, %19 : vector<16x128xf32>
    %cst_10 = arith.constant 9.99999974E-6 : f32
    %21 = vector.broadcast %cst_10 : f32 to vector<16x1xf32>
    %22 = arith.addf %18, %21 : vector<16x1xf32>
    %23 = math.rsqrt %22 : vector<16x1xf32>
    %24 = vector.broadcast %23 : vector<16x1xf32> to vector<16x128xf32>
    %25 = arith.mulf %20, %24 : vector<16x128xf32>
    %c0_11 = arith.constant 0 : index
    %c0_12 = arith.constant 0 : index
    %26 = vector.load %arg4[%c0_11, %c0_12] : memref<1x128xf32, #tpu.memory_space<vmem>>, vector<1x128xf32>
    %27 = vector.broadcast %26 : vector<1x128xf32> to vector<16x128xf32>
    %28 = arith.mulf %25, %27 : vector<16x128xf32>
    %c0_13 = arith.constant 0 : index
    %c0_14 = arith.constant 0 : index
    %29 = vector.load %arg5[%c0_13, %c0_14] : memref<1x128xf32, #tpu.memory_space<vmem>>, vector<1x128xf32>
    %30 = vector.broadcast %29 : vector<1x128xf32> to vector<16x128xf32>
    %31 = arith.addf %28, %30 : vector<16x128xf32>
    %cst_15 = arith.constant 0.000000e+00 : f32
    %32 = vector.broadcast %cst_15 : f32 to vector<16x128xf32>
    %33 = arith.cmpf ogt, %31, %32 : vector<16x128xf32>
    %cst_16 = arith.constant 0.00999999977 : f32
    %34 = vector.broadcast %cst_16 : f32 to vector<16x128xf32>
    %35 = arith.mulf %34, %31 : vector<16x128xf32>
    %36 = arith.select %33, %31, %35 : vector<16x128xi1>, vector<16x128xf32>
    %37 = arith.truncf %36 : vector<16x128xf32> to vector<16x128xbf16>
    %c0_17 = arith.constant 0 : index
    %c0_18 = arith.constant 0 : index
    %38 = vector.load %arg6[%c0_17, %c0_18] : memref<128x128xbf16, #tpu.memory_space<vmem>>, vector<128x128xbf16>
    %cst_19 = arith.constant dense<0.000000e+00> : vector<16x128xf32>
    %39 = tpu.matmul %37, %38, %cst_19 {dimension_numbers = #tpu.dot_dimension_numbers<[1], [0], [0], [1], [0, 0, 1, 1], [], []>} : vector<16x128xbf16>, vector<128x128xbf16>, vector<16x128xf32> -> vector<16x128xf32>
    %c0_20 = arith.constant 0 : index
    %c0_21 = arith.constant 0 : index
    %40 = vector.load %arg7[%c0_20, %c0_21] : memref<1x128xf32, #tpu.memory_space<vmem>>, vector<1x128xf32>
    %41 = vector.broadcast %40 : vector<1x128xf32> to vector<16x128xf32>
    %42 = arith.addf %39, %41 : vector<16x128xf32>
    %cst_22 = arith.constant dense<0.000000e+00> : vector<16xf32>
    %43 = vector.multi_reduction <add>, %42, %cst_22 [1] : vector<16x128xf32> to vector<16xf32>
    %44 = vector.shape_cast %43 : vector<16xf32> to vector<16x1xf32>
    %cst_23 = arith.constant 3.125000e-02 : f32
    %45 = vector.broadcast %cst_23 : f32 to vector<16x1xf32>
    %46 = arith.mulf %44, %45 : vector<16x1xf32>
    %47 = arith.mulf %42, %42 : vector<16x128xf32>
    %cst_24 = arith.constant dense<0.000000e+00> : vector<16xf32>
    %48 = vector.multi_reduction <add>, %47, %cst_24 [1] : vector<16x128xf32> to vector<16xf32>
    %49 = vector.shape_cast %48 : vector<16xf32> to vector<16x1xf32>
    %cst_25 = arith.constant 3.125000e-02 : f32
    %50 = vector.broadcast %cst_25 : f32 to vector<16x1xf32>
    %51 = arith.mulf %49, %50 : vector<16x1xf32>
    %52 = arith.mulf %46, %46 : vector<16x1xf32>
    %53 = arith.subf %51, %52 : vector<16x1xf32>
    %cst_26 = arith.constant 0.000000e+00 : f32
    %54 = vector.broadcast %cst_26 : f32 to vector<16x1xf32>
    %55 = arith.maximumf %53, %54 : vector<16x1xf32>
    %56 = vector.broadcast %46 : vector<16x1xf32> to vector<16x128xf32>
    %57 = arith.subf %42, %56 : vector<16x128xf32>
    %cst_27 = arith.constant 9.99999974E-6 : f32
    %58 = vector.broadcast %cst_27 : f32 to vector<16x1xf32>
    %59 = arith.addf %55, %58 : vector<16x1xf32>
    %60 = math.rsqrt %59 : vector<16x1xf32>
    %61 = vector.broadcast %60 : vector<16x1xf32> to vector<16x128xf32>
    %62 = arith.mulf %57, %61 : vector<16x128xf32>
    %c0_28 = arith.constant 0 : index
    %c0_29 = arith.constant 0 : index
    %63 = vector.load %arg8[%c0_28, %c0_29] : memref<1x128xf32, #tpu.memory_space<vmem>>, vector<1x128xf32>
    %64 = vector.broadcast %63 : vector<1x128xf32> to vector<16x128xf32>
    %65 = arith.mulf %62, %64 : vector<16x128xf32>
    %c0_30 = arith.constant 0 : index
    %c0_31 = arith.constant 0 : index
    %66 = vector.load %arg9[%c0_30, %c0_31] : memref<1x128xf32, #tpu.memory_space<vmem>>, vector<1x128xf32>
    %67 = vector.broadcast %66 : vector<1x128xf32> to vector<16x128xf32>
    %68 = arith.addf %65, %67 : vector<16x128xf32>
    %cst_32 = arith.constant 0.000000e+00 : f32
    %69 = vector.broadcast %cst_32 : f32 to vector<16x128xf32>
    %70 = arith.cmpf ogt, %68, %69 : vector<16x128xf32>
    %cst_33 = arith.constant 0.00999999977 : f32
    %71 = vector.broadcast %cst_33 : f32 to vector<16x128xf32>
    %72 = arith.mulf %71, %68 : vector<16x128xf32>
    %73 = arith.select %70, %68, %72 : vector<16x128xi1>, vector<16x128xf32>
    %74 = arith.truncf %73 : vector<16x128xf32> to vector<16x128xbf16>
    %c0_34 = arith.constant 0 : index
    %c0_35 = arith.constant 0 : index
    %75 = vector.load %arg10[%c0_34, %c0_35] : memref<128x128xbf16, #tpu.memory_space<vmem>>, vector<128x128xbf16>
    %cst_36 = arith.constant dense<0.000000e+00> : vector<16x128xf32>
    %76 = tpu.matmul %74, %75, %cst_36 {dimension_numbers = #tpu.dot_dimension_numbers<[1], [0], [0], [1], [0, 0, 1, 1], [], []>} : vector<16x128xbf16>, vector<128x128xbf16>, vector<16x128xf32> -> vector<16x128xf32>
    %c0_37 = arith.constant 0 : index
    %c0_38 = arith.constant 0 : index
    %77 = vector.load %arg11[%c0_37, %c0_38] : memref<1x128xf32, #tpu.memory_space<vmem>>, vector<1x128xf32>
    %78 = vector.broadcast %77 : vector<1x128xf32> to vector<16x128xf32>
    %79 = arith.addf %76, %78 : vector<16x128xf32>
    %c0_39 = arith.constant 0 : index
    %c0_40 = arith.constant 0 : index
    %80 = vector.load %arg12[%c0_39, %c0_40] : memref<16x128xf32, #tpu.memory_space<vmem>>, vector<16x128xf32>
    tpu.vector_store %arg12[%c0_39, %c0_40], %79 {strides = array<i32>} : memref<16x128xf32, #tpu.memory_space<vmem>>, vector<16x128xf32>,
    return
  }
  func.func @transform_0(%arg0: i32) -> (i32, i32) {
    %c0_i32 = arith.constant 0 : i32
    %c0_i32_0 = arith.constant 0 : i32
    return %arg0, %c0_i32 : i32, i32
  }
  func.func @transform_1(%arg0: i32) -> (i32, i32) {
    %c0_i32 = arith.constant 0 : i32
    %c0_i32_0 = arith.constant 0 : i32
    %c0_i32_1 = arith.constant 0 : i32
    return %c0_i32, %c0_i32_0 : i32, i32
  }
  func.func @transform_2(%arg0: i32) -> (i32, i32) {
    %c0_i32 = arith.constant 0 : i32
    %c0_i32_0 = arith.constant 0 : i32
    %c0_i32_1 = arith.constant 0 : i32
    return %c0_i32, %c0_i32_0 : i32, i32
  }
  func.func @transform_3(%arg0: i32) -> (i32, i32) {
    %c0_i32 = arith.constant 0 : i32
    %c0_i32_0 = arith.constant 0 : i32
    %c0_i32_1 = arith.constant 0 : i32
    return %c0_i32, %c0_i32_0 : i32, i32
  }
  func.func @transform_4(%arg0: i32) -> (i32, i32) {
    %c0_i32 = arith.constant 0 : i32
    %c0_i32_0 = arith.constant 0 : i32
    %c0_i32_1 = arith.constant 0 : i32
    return %c0_i32, %c0_i32_0 : i32, i32
  }
  func.func @transform_5(%arg0: i32) -> (i32, i32) {
    %c0_i32 = arith.constant 0 : i32
    %c0_i32_0 = arith.constant 0 : i32
    %c0_i32_1 = arith.constant 0 : i32
    return %c0_i32, %c0_i32_0 : i32, i32
  }
  func.func @transform_6(%arg0: i32) -> (i32, i32) {
    %c0_i32 = arith.constant 0 : i32
    %c0_i32_0 = arith.constant 0 : i32
    %c0_i32_1 = arith.constant 0 : i32
    return %c0_i32, %c0_i32_0 : i32, i32
  }
  func.func @transform_7(%arg0: i32) -> (i32, i32) {
    %c0_i32 = arith.constant 0 : i32
    %c0_i32_0 = arith.constant 0 : i32
    %c0_i32_1 = arith.constant 0 : i32
    return %c0_i32, %c0_i32_0 : i32, i32
  }
  func.func @transform_8(%arg0: i32) -> (i32, i32) {
    %c0_i32 = arith.constant 0 : i32
    %c0_i32_0 = arith.constant 0 : i32
    %c0_i32_1 = arith.constant 0 : i32
    return %c0_i32, %c0_i32_0 : i32, i32
  }
  func.func @transform_9(%arg0: i32) -> (i32, i32) {
    %c0_i32 = arith.constant 0 : i32
    %c0_i32_0 = arith.constant 0 : i32
    %c0_i32_1 = arith.constant 0 : i32
    return %c0_i32, %c0_i32_0 : i32, i32
  }
  func.func @transform_10(%arg0: i32) -> (i32, i32) {
    %c0_i32 = arith.constant 0 : i32
    %c0_i32_0 = arith.constant 0 : i32
    %c0_i32_1 = arith.constant 0 : i32
    return %c0_i32, %c0_i32_0 : i32, i32
  }
  func.func @transform_11(%arg0: i32) -> (i32, i32) {
    %c0_i32 = arith.constant 0 : i32
    %c0_i32_0 = arith.constant 0 : i32
    return %arg0, %c0_i32 : i32, i32
  }
}

</mosaic_0001>

<bundles_post_ra>
// kernel: tpu_custom_call.1
= control target key start
LH: loop header
LB: loop body
LE: loop exit
PB: predicated region body
PF: predicated region fallthrough
CT: control target
= control target key end

     0   :  { %16 = vsyncpa [#allocation3], 0  ;;  %s1055_s0 = inlined_call_operand.hbm [shape: bf16[16,128], index: 0, kind: input, shape index: {}]   ;;  %s1056_s1 = inlined_call_operand.hbm [shape: bf16[128,128], index: 1, kind: input, shape index: {}]   ;;  %s1057_s2 = inlined_call_operand.vmem [shape: f32[1,128], index: 2, kind: input, shape index: {}]   ;;  %s1058_s3 = inlined_call_operand.vmem [shape: f32[1,128], index: 3, kind: input, shape index: {}]   ;;  %s1059_s4 = inlined_call_operand.vmem [shape: f32[1,128], index: 4, kind: input, shape index: {}]   ;;  %s1060_s5 = inlined_call_operand.hbm [shape: bf16[128,128], index: 5, kind: input, shape index: {}]   ;;  %s1061_s6 = inlined_call_operand.vmem [shape: f32[1,128], index: 6, kind: input, shape index: {}]   ;;  %s1062_s7 = inlined_call_operand.vmem [shape: f32[1,128], index: 7, kind: input, shape index: {}]   ;;  %s1063_s8 = inlined_call_operand.vmem [shape: f32[1,128], index: 8, kind: input, shape index: {}]   ;;  %s1064_s9 = inlined_call_operand.hbm [shape: bf16[128,128], index: 9, kind: input, shape index: {}]   ;;  %s1065_s10 = inlined_call_operand.vmem [shape: f32[1,128], index: 10, kind: input, shape index: {}]   ;;  %s1066_s11 = inlined_call_operand.hbm [shape: f32[16,128], index: 11, kind: output, shape index: {}]  }
   0x1   :  { %17 = vsyncpa [#allocation6], 0 }
   0x2   :  { %18 = vsyncpa [#allocation9], 0 }
   0x3   :  { %19 = vsyncpa [#allocation4], 0  ;;  %s847_s17 = smov [#allocation5]   ;;  %s848_s19 = smov [#allocation2]  }
   0x4   :  { %s37_s18 = sshll.u32 %s847_s17, 4  ;;  %s25_s20 = sshll.u32 %s848_s19, 4  ;;  %s38_s18 = int_to_ptr.vmem [resolvable:$true] %s37_s18  ;;  %s918_s20 = int_to_ptr.vmem [resolvable:$true] %s25_s20 }
   0x5   :  { %s729_s23 = scalar_lea.hbm %s1056_s1, 1024 }
   0x6   :  { %p730_p0 = scmp.ne.s32.totalorder %s1056_s1, %s729_s23  ;;  %p733_p1 = scmp.lt.u32.totalorder %s729_s23, %s1056_s1 }
   0x8   :  { %p735_p2 = pnand %p733_p1, %p730_p0 }
   0xa   :  { %738 = shalt.err (!%p735_p2)
}
   0xb   :  { %s739_s28 = scalar_lea.vmem %s38_s18, 1024  ;;  %p744_p4 = scmp.lt.s32.totalorder %s38_s18, %s38_s18 }
   0xc   :  { %p740_p3 = scmp.ne.s32.totalorder %s38_s18, %s739_s28  ;;  %p745_p5 = scmp.lt.s32.totalorder %s739_s28, %s739_s28 }
   0xe   :  { %p746_p6 = por %p745_p5, %p744_p4 }
  0x10   :  { %p747_p7 = pnand %p746_p6, %p740_p3 }
  0x12   :  { %750 = shalt.err (!%p747_p7)
}
  0x13   :  { %s849_s29 = smov 64   ;;  %s850_s30 = smov 4  }
  0x14   :  { %43 = dma.hbm_to_vmem [thread:$0]  %s1056_s1, 1024, %s38_s18, [#allocation6], %s849_s29, %s849_s29, %s850_s30  }
  0x15   :  { %s751_s16 = scalar_lea.hbm %s1055_s0, 128 }
  0x16   :  { %p752_p8 = scmp.ne.s32.totalorder %s1055_s0, %s751_s16  ;;  %p755_p9 = scmp.lt.u32.totalorder %s751_s16, %s1055_s0 }
  0x18   :  { %p757_p10 = pnand %p755_p9, %p752_p8 }
  0x1a   :  { %760 = shalt.err (!%p757_p10)
}
  0x1b   :  { %s761_s23 = scalar_lea.vmem %s918_s20, 128  ;;  %p766_p12 = scmp.lt.s32.totalorder %s918_s20, %s918_s20 }
  0x1c   :  { %p762_p11 = scmp.ne.s32.totalorder %s918_s20, %s761_s23  ;;  %p767_p13 = scmp.lt.s32.totalorder %s761_s23, %s761_s23 }
  0x1e   :  { %p768_p0 = por %p767_p13, %p766_p12 }
  0x20   :  { %p769_p1 = pnand %p768_p0, %p762_p11 }
  0x22   :  { %772 = shalt.err (!%p769_p1)
}
  0x23   :  { %31 = dma.hbm_to_vmem [thread:$0]  %s1055_s0, 128, %s918_s20, [#allocation3], %s849_s29, %s849_s29, %s850_s30  }
  0x24   :  { %s851_s24 = smov [#allocation7]   ;;  %s852_s26 = smov [#allocation8]  }
  0x25   :  { %s55_s25 = sshll.u32 %s851_s24, 4  ;;  %s73_s27 = sshll.u32 %s852_s26, 4  ;;  %s56_s25 = int_to_ptr.vmem [resolvable:$true] %s55_s25  ;;  %s955_s27 = int_to_ptr.vmem [resolvable:$true] %s73_s27 }
  0x26   :  { %s773_s13 = scalar_lea.hbm %s1060_s5, 1024 }
  0x27   :  { %p774_p2 = scmp.ne.s32.totalorder %s1060_s5, %s773_s13  ;;  %p777_p3 = scmp.lt.u32.totalorder %s773_s13, %s1060_s5 }
  0x29   :  { %p779_p4 = pnand %p777_p3, %p774_p2 }
  0x2b   :  { %782 = shalt.err (!%p779_p4)
}
  0x2c   :  { %s783_s0 = scalar_lea.vmem %s56_s25, 1024  ;;  %p788_p6 = scmp.lt.s32.totalorder %s56_s25, %s56_s25 }
  0x2d   :  { %p784_p5 = scmp.ne.s32.totalorder %s56_s25, %s783_s0  ;;  %p789_p7 = scmp.lt.s32.totalorder %s783_s0, %s783_s0 }
  0x2f   :  { %p790_p8 = por %p789_p7, %p788_p6 }
  0x31   :  { %p791_p9 = pnand %p790_p8, %p784_p5 }
  0x33   :  { %794 = shalt.err (!%p791_p9)
}
  0x34   :  { %61 = dma.hbm_to_vmem [thread:$0]  %s1060_s5, 1024, %s56_s25, [#allocation6], %s849_s29, %s849_s29, %s850_s30  }
  0x35   :  { %s795_s23 = scalar_lea.hbm %s1064_s9, 1024 }
  0x36   :  { %p796_p10 = scmp.ne.s32.totalorder %s1064_s9, %s795_s23  ;;  %p799_p11 = scmp.lt.u32.totalorder %s795_s23, %s1064_s9 }
  0x38   :  { %p801_p12 = pnand %p799_p11, %p796_p10 }
  0x3a   :  { %804 = shalt.err (!%p801_p12)
}
  0x3b   :  { %s805_s28 = scalar_lea.vmem %s955_s27, 1024  ;;  %p810_p0 = scmp.lt.s32.totalorder %s955_s27, %s955_s27 }
  0x3c   :  { %p806_p13 = scmp.ne.s32.totalorder %s955_s27, %s805_s28  ;;  %p811_p1 = scmp.lt.s32.totalorder %s805_s28, %s805_s28 }
  0x3e   :  { %p812_p2 = por %p811_p1, %p810_p0 }
  0x40   :  { %p813_p3 = pnand %p812_p2, %p806_p13 }
  0x42   :  { %816 = shalt.err (!%p813_p3)
}
  0x43   :  { %79 = dma.hbm_to_vmem [thread:$0]  %s1064_s9, 1024, %s955_s27, [#allocation9], %s849_s29, %s849_s29, %s850_s30  }
  0x44   :  { %839 = dma.done.wait [#allocation3], 128  }
  0x45   :  { %840 = vsyncadd [#allocation3], 4294967168 }
  0x46   :  { %841 = dma.done.wait [#allocation6], 2048  }
  0x47   :  { %842 = vsyncadd [#allocation6], 4294965248 }
  0x48   :  { %843 = dma.done.wait [#allocation9], 1024  }
  0x49   :  { %844 = vsyncadd [#allocation9], 4294966272  ;;  %v853_v0 = vmov 0.0   ;;  %vm854_vm0 = vmmov 0   ;;  %v696_v1 = vld [vmem:[#allocation5] sm:$0xff]   ;;  %v697_v2 = vld [vmem:[#allocation5 + $0x8] sm:$0xff]  }
  0x4a   :  { %625 = vmatprep.subr.bf16.mxu0 %v853_v0  ;;  %641 = vmatprep.mubr.msk.bf16.mxu0 %vm854_vm0, %v853_v0  ;;  %v698_v3 = vld [vmem:[#allocation5 + $0x10] sm:$0xff]   ;;  %v699_v4 = vld [vmem:[#allocation5 + $0x18] sm:$0xff]   ;;  %v700_v5 = vld [vmem:[#allocation5 + $0x20] sm:$0xff]   ;;  %s855_s17 = smov [#allocation10]  }
  0x4b   :  { %645 = vmatprep.subr.bf16.mxu1 %v853_v0  ;;  %661 = vmatprep.mubr.msk.bf16.mxu1 %vm854_vm0, %v853_v0  ;;  %v701_v6 = vld [vmem:[#allocation5 + $0x28] sm:$0xff]   ;;  %v702_v7 = vld [vmem:[#allocation5 + $0x30] sm:$0xff]   ;;  %v703_v8 = vld [vmem:[#allocation5 + $0x38] sm:$0xff]   ;;  %s552_s0 = sshll.u32 %s855_s17, 4  ;;  %s553_s0 = int_to_ptr.vmem [resolvable:$true] %s552_s0 }
  0x4c   :  { %626 = vmatpush3.bf16.msra.mxu0 %v696_v1  ;;  %v704_v9 = vld [vmem:[#allocation2] sm:$0xff]   ;;  %v705_v19 = vld [vmem:[#allocation7] sm:$0xff]   ;;  %v706_v20 = vld [vmem:[#allocation7 + $0x8] sm:$0xff]   ;;  %p822_p5 = scmp.lt.s32.totalorder %s553_s0, %s553_s0 }
  0x4d   :  { %627 = vmatprep.subr.bf16.mxu0 %v853_v0  ;;  %v566_v10 = vld [vmem:[%s1057_s2] ss:$0 sm:$0xff]  ;;  %646 = vmatpush3.bf16.msra.mxu1 %v705_v19  ;;  %v707_v21 = vld [vmem:[#allocation7 + $0x10] sm:$0xff]   ;;  %v709_v23 = vld [vmem:[#allocation7 + $0x20] sm:$0xff]  }
  0x4e   :  { %647 = vmatprep.subr.bf16.mxu1 %v853_v0  ;;  %v708_v22 = vld [vmem:[#allocation7 + $0x18] sm:$0xff]   ;;  %v710_v24 = vld [vmem:[#allocation7 + $0x28] sm:$0xff]   ;;  %v711_v25 = vld [vmem:[#allocation7 + $0x30] sm:$0xff]  }
  0x4f   :  { %v712_v26 = vld [vmem:[#allocation7 + $0x38] sm:$0xff]  }
  0x50   :  { %628 = vmatpush3.bf16.msra.mxu0 %v697_v2  ;;  %v576_v45 = vld [vmem:[%s1058_s3] ss:$0 sm:$0xff] }
  0x51   :  { %629 = vmatprep.subr.bf16.mxu0 %v853_v0  ;;  %648 = vmatpush3.bf16.msra.mxu1 %v706_v20  ;;  %v577_v47 = vld [vmem:[%s1059_s4] ss:$0 sm:$0xff] }
  0x52   :  { %649 = vmatprep.subr.bf16.mxu1 %v853_v0  ;;  %v578_v60 = vld [vmem:[%s1061_s6] ss:$0 sm:$0xff] }
  0x54   :  { %630 = vmatpush3.bf16.msra.mxu0 %v698_v3 }
  0x55   :  { %631 = vmatprep.subr.bf16.mxu0 %v853_v0  ;;  %650 = vmatpush3.bf16.msra.mxu1 %v707_v21 }
  0x56   :  { %651 = vmatprep.subr.bf16.mxu1 %v853_v0 }
  0x58   :  { %632 = vmatpush3.bf16.msra.mxu0 %v699_v4 }
  0x59   :  { %633 = vmatprep.subr.bf16.mxu0 %v853_v0  ;;  %652 = vmatpush3.bf16.msra.mxu1 %v708_v22 }
  0x5a   :  { %653 = vmatprep.subr.bf16.mxu1 %v853_v0 }
  0x5c   :  { %634 = vmatpush3.bf16.msra.mxu0 %v700_v5 }
  0x5d   :  { %635 = vmatprep.subr.bf16.mxu0 %v853_v0  ;;  %654 = vmatpush3.bf16.msra.mxu1 %v709_v23 }
  0x5e   :  { %655 = vmatprep.subr.bf16.mxu1 %v853_v0 }
  0x60   :  { %636 = vmatpush3.bf16.msra.mxu0 %v701_v6  ;;  %v713_v6 = vld [vmem:[#allocation8] sm:$0xff]  }
  0x61   :  { %637 = vmatprep.subr.bf16.mxu0 %v853_v0  ;;  %656 = vmatpush3.bf16.msra.mxu1 %v710_v24 }
  0x62   :  { %657 = vmatprep.subr.bf16.mxu1 %v853_v0 }
  0x64   :  { %638 = vmatpush3.bf16.msra.mxu0 %v702_v7  ;;  %v714_v7 = vld [vmem:[#allocation8 + $0x8] sm:$0xff]  }
  0x65   :  { %639 = vmatprep.subr.bf16.mxu0 %v853_v0  ;;  %658 = vmatpush3.bf16.msra.mxu1 %v711_v25 }
  0x66   :  { %659 = vmatprep.subr.bf16.mxu1 %v853_v0 }
  0x68   :  { %640 = vmatpush3.bf16.msra.mxu0 %v703_v8  ;;  %v715_v8 = vld [vmem:[#allocation8 + $0x10] sm:$0xff]  }
  0x69   :  { %665 = vmatprep.subr.bf16.mxu0 %v853_v0  ;;  %660 = vmatpush3.bf16.msra.mxu1 %v712_v26 }
  0x6b   :  { %642 = vmatmul.mubr.bf16.vlgmr.msra.gmra.mrb[0].mxu0 %v704_v9  ;;  %v716_v9 = vld [vmem:[#allocation8 + $0x18] sm:$0xff]  }
  0x6c   :  { %681 = vmatprep.mubr.msk.bf16.mxu0 %vm854_vm0, %v853_v0  ;;  %666 = vmatpush3.bf16.msra.mxu0 %v713_v6 }
  0x6d   :  { %667 = vmatprep.subr.bf16.mxu0 %v853_v0 }
  0x70   :  { %668 = vmatpush3.bf16.msra.mxu0 %v714_v7 }
  0x71   :  { %669 = vmatprep.subr.bf16.mxu0 %v853_v0 }
  0x74   :  { %670 = vmatpush3.bf16.msra.mxu0 %v715_v8 }
  0x75   :  { %671 = vmatprep.subr.bf16.mxu0 %v853_v0 }
  0x78   :  { %672 = vmatpush3.bf16.msra.mxu0 %v716_v9 }
  0x79   :  { %673 = vmatprep.subr.bf16.mxu0 %v853_v0 }
 0x13e   :  { %v208_v11 = vpop.f32.mrb[0].mxu0 }
 0x13f   :  { %v209_v12 = vadd.f32 %v566_v10, %v208_v11  ;;  %v643_v13 = vpop.f32.mrb[1].mxu0  ;;  %v718_v11 = vld [vmem:[#allocation8 + $0x28] sm:$0xff]  }
 0x140   :  { %v211_v14 = vpop.f32.mrb[2].mxu0  ;;  %v720_v13 = vld [vmem:[#allocation8 + $0x38] sm:$0xff]  }
 0x141   :  { %v212_v15 = vadd.f32 %v566_v10, %v211_v14  ;;  %215 = vadd.xlane.f32.xlu0 %v209_v12  ;;  %v644_v16 = vpop.f32.mrb[3].mxu0  ;;  %v221_v17 = vmul.f32 %v209_v12, %v209_v12  ;;  %v717_v10 = vld [vmem:[#allocation8 + $0x20] sm:$0xff]  }
 0x142   :  { %674 = vmatpush3.bf16.msra.mxu0 %v717_v10 }
 0x143   :  { %223 = vadd.xlane.f32.xlu1 %v221_v17  ;;  %v222_v18 = vmul.f32 %v212_v15, %v212_v15  ;;  %675 = vmatprep.subr.bf16.mxu0 %v853_v0 }
 0x145   :  { %217 = vadd.xlane.f32.xlu0 %v212_v15 }
 0x146   :  { %676 = vmatpush3.bf16.msra.mxu0 %v718_v11 }
 0x147   :  { %225 = vadd.xlane.f32.xlu1 %v222_v18  ;;  %677 = vmatprep.subr.bf16.mxu0 %v853_v0 }
 0x1ce   :  { %v216_v27 = vpop.xlane.xlu0 %215 }
 0x1cf   :  { %v219_v28 = vmul.f32 0.015625, %v216_v27 }
 0x1d0   :  { %v224_v29 = vpop.xlane.xlu1 %223 }
 0x1d1   :  { %v229_v30 = vmul.f32 %v219_v28, %v219_v28  ;;  %v227_v31 = vmul.f32 0.015625, %v224_v29  ;;  %v235_v43 = vsub.f32 %v209_v12, %v219_v28  ;;  %v719_v12 = vld [vmem:[#allocation8 + $0x30] sm:$0xff]  }
 0x1d2   :  { %v218_v32 = vpop.xlane.xlu0 %217  ;;  %678 = vmatpush3.bf16.msra.mxu0 %v719_v12 }
 0x1d3   :  { %v231_v33 = vsub.f32 %v227_v31, %v229_v30  ;;  %v220_v34 = vmul.f32 0.015625, %v218_v32  ;;  %679 = vmatprep.subr.bf16.mxu0 %v853_v0  ;;  %v587_v31 = vld [vmem:[%s1062_s7] ss:$0 sm:$0xff] }
 0x1d4   :  { %v226_v35 = vpop.xlane.xlu1 %225 }
 0x1d5   :  { %v233_v36 = vmax.f32 %v231_v33, 0.0  ;;  %v230_v37 = vmul.f32 %v220_v34, %v220_v34  ;;  %v228_v38 = vmul.f32 0.015625, %v226_v35  ;;  %v236_v48 = vsub.f32 %v212_v15, %v220_v34  ;;  %v588_v35 = vld [vmem:[%s1063_s8] ss:$0 sm:$0xff]  ;;  %s817_s8 = scalar_lea.vmem %s553_s0, 256 }
 0x1d6   :  { %680 = vmatpush3.bf16.msra.mxu0 %v720_v13  ;;  %p818_p4 = scmp.ne.s32.totalorder %s553_s0, %s817_s8  ;;  %p823_p6 = scmp.lt.s32.totalorder %s817_s8, %s817_s8 }
 0x1d7   :  { %v237_v39 = vadd.f32 1e-05, %v233_v36  ;;  %v232_v40 = vsub.f32 %v228_v38, %v230_v37 }
 0x1d8   :  { %p824_p7 = por %p823_p6, %p822_p5 }
 0x1d9   :  { %721 = vrsqrt.f32 %v237_v39  ;;  %v234_v41 = vmax.f32 %v232_v40, 0.0 }
 0x1da   :  { %p825_p8 = pnand %p824_p7, %p818_p4 }
 0x1db   :  { %v238_v42 = vadd.f32 1e-05, %v234_v41 }
 0x1dd   :  { %723 = vrsqrt.f32 %v238_v42 }
 0x1e3   :  { %v722_v44 = vpop.eup %721 }
 0x1e4   :  { %v241_v46 = vmul.f32 %v722_v44, %v235_v43 }
 0x1e6   :  { %v250_v49 = vmul.f32 %v576_v45, %v241_v46  ;;  %v589_v46 = vld [vmem:[%s1065_s10] ss:$0 sm:$0xff] }
 0x1e7   :  { %v724_v50 = vpop.eup %723 }
 0x1e8   :  { %v242_v51 = vmul.f32 %v724_v50, %v236_v48  ;;  %v259_v52 = vadd.f32 %v577_v47, %v250_v49 }
 0x1ea   :  { %v251_v53 = vmul.f32 %v576_v45, %v242_v51  ;;  %v263_v55 = vmul.f32 0.01, %v259_v52  ;;  %vm261_vm1 = vcmp.gt.f32.partialorder %v259_v52, 0.0 }
 0x1ec   :  { %v260_v54 = vadd.f32 %v577_v47, %v251_v53  ;;  %v265_v57 = vsel %vm261_vm1, %v259_v52, %v263_v55 }
 0x1ee   :  { %vm262_vm2 = vcmp.gt.f32.partialorder %v260_v54, 0.0  ;;  %v264_v56 = vmul.f32 0.01, %v260_v54 }
 0x1f0   :  { %v266_v58 = vsel %vm262_vm2, %v260_v54, %v264_v56 }
 0x1f1   :  { %v267_v59 = vpack.c.bf16 %v266_v58, %v265_v57 }
 0x1f3   :  { %662 = vmatmul.mubr.bf16.vlgmr.msra.gmra.mrb[0].mxu1 %v267_v59 }
 0x2c6   :  { %v373_v61 = vpop.f32.mrb[0].mxu1 }
 0x2c7   :  { %v374_v62 = vadd.f32 %v578_v60, %v373_v61  ;;  %v663_v63 = vpop.f32.mrb[1].mxu1 }
 0x2c8   :  { %v376_v1 = vpop.f32.mrb[2].mxu1 }
 0x2c9   :  { %v377_v2 = vadd.f32 %v578_v60, %v376_v1  ;;  %380 = vadd.xlane.f32.xlu0 %v374_v62  ;;  %v664_v3 = vpop.f32.mrb[3].mxu1  ;;  %v386_v4 = vmul.f32 %v374_v62, %v374_v62 }
 0x2cb   :  { %382 = vadd.xlane.f32.xlu1 %v377_v2  ;;  %v387_v5 = vmul.f32 %v377_v2, %v377_v2 }
 0x2cd   :  { %388 = vadd.xlane.f32.xlu0 %v386_v4 }
 0x2cf   :  { %390 = vadd.xlane.f32.xlu1 %v387_v5 }
 0x356   :  { %v381_v14 = vpop.xlane.xlu0 %380 }
 0x357   :  { %v384_v15 = vmul.f32 0.03125, %v381_v14 }
 0x358   :  { %v383_v16 = vpop.xlane.xlu1 %382 }
 0x359   :  { %v385_v17 = vmul.f32 0.03125, %v383_v16  ;;  %v394_v19 = vmul.f32 %v384_v15, %v384_v15  ;;  %v400_v0 = vsub.f32 %v374_v62, %v384_v15 }
 0x35a   :  { %v389_v18 = vpop.xlane.xlu0 %388 }
 0x35b   :  { %v392_v20 = vmul.f32 0.03125, %v389_v18  ;;  %v395_v22 = vmul.f32 %v385_v17, %v385_v17  ;;  %v401_v32 = vsub.f32 %v377_v2, %v385_v17 }
 0x35c   :  { %v391_v21 = vpop.xlane.xlu1 %390 }
 0x35d   :  { %v396_v23 = vsub.f32 %v392_v20, %v394_v19  ;;  %v393_v24 = vmul.f32 0.03125, %v391_v21 }
 0x35f   :  { %v398_v25 = vmax.f32 %v396_v23, 0.0  ;;  %v397_v26 = vsub.f32 %v393_v24, %v395_v22 }
 0x361   :  { %v402_v27 = vadd.f32 1e-05, %v398_v25  ;;  %v399_v28 = vmax.f32 %v397_v26, 0.0 }
 0x363   :  { %725 = vrsqrt.f32 %v402_v27  ;;  %v403_v29 = vadd.f32 1e-05, %v399_v28 }
 0x365   :  { %727 = vrsqrt.f32 %v403_v29 }
 0x36d   :  { %v726_v30 = vpop.eup %725 }
 0x36e   :  { %v406_v33 = vmul.f32 %v726_v30, %v400_v0 }
 0x36f   :  { %v728_v34 = vpop.eup %727 }
 0x370   :  { %v407_v36 = vmul.f32 %v728_v34, %v401_v32  ;;  %v415_v37 = vmul.f32 %v587_v31, %v406_v33 }
 0x372   :  { %v416_v38 = vmul.f32 %v587_v31, %v407_v36  ;;  %v424_v39 = vadd.f32 %v588_v35, %v415_v37 }
 0x374   :  { %v425_v40 = vadd.f32 %v588_v35, %v416_v38  ;;  %v428_v41 = vmul.f32 0.01, %v424_v39  ;;  %vm426_vm3 = vcmp.gt.f32.partialorder %v424_v39, 0.0 }
 0x376   :  { %vm427_vm4 = vcmp.gt.f32.partialorder %v425_v40, 0.0  ;;  %v429_v42 = vmul.f32 0.01, %v425_v40  ;;  %v430_v43 = vsel %vm426_vm3, %v424_v39, %v428_v41 }
 0x378   :  { %v431_v44 = vsel %vm427_vm4, %v425_v40, %v429_v42 }
 0x379   :  { %v432_v45 = vpack.c.bf16 %v431_v44, %v430_v43 }
 0x37b   :  { %682 = vmatmul.mubr.bf16.vlgmr.msra.gmra.mrb[4].mxu0 %v432_v45 }
 0x44e   :  { %v538_v47 = vpop.f32.mrb[4].mxu0 }
 0x44f   :  { %v539_v48 = vadd.f32 %v589_v46, %v538_v47  ;;  %v683_v49 = vpop.f32.mrb[5].mxu0 }
 0x450   :  { %v541_v50 = vpop.f32.mrb[6].mxu0 }
 0x451   :  { %545 = vst [vmem:[#allocation10] sm:$0xff] %v539_v48  ;;  %v542_v51 = vadd.f32 %v589_v46, %v541_v50  ;;  %v684_v52 = vpop.f32.mrb[7].mxu0 }
 0x453   :  { %546 = vst [vmem:[#allocation10 + $0x8] sm:$0xff] %v542_v51 }
 0x454   :  { %828 = shalt.err (!%p825_p8)
}
 0x455   :  { %s829_s19 = scalar_lea.hbm %s1066_s11, 256 }
 0x456   :  { %p830_p9 = scmp.ne.s32.totalorder %s1066_s11, %s829_s19  ;;  %p833_p10 = scmp.lt.u32.totalorder %s829_s19, %s1066_s11 }
 0x458   :  { %p835_p11 = pnand %p833_p10, %p830_p9 }
 0x45a   :  { %838 = shalt.err (!%p835_p11)
}
 0x45b   :  { %s856_s18 = smov 128   ;;  %s857_s24 = smov 8  }
 0x45c   :  { %558 = dma.vmem_to_hbm [thread:$0]  %s553_s0, 256, %s1066_s11, [#allocation4], %s856_s18, %s856_s18, %s857_s24  }
 0x45d   :  { %845 = dma.done.wait [#allocation4], 256  }
 0x45e   :  { %846 = vsyncadd [#allocation4], 4294967040 }
 0x45f   :  { %562 = vsyncpa [#allocation3], 1 }
 0x460   :  { %563 = vsyncpa [#allocation6], 1 }
 0x461   :  { %564 = vsyncpa [#allocation9], 1 }
 0x462   :  { %565 = vsyncpa [#allocation4], 1 }

</bundles_post_ra>
